<compile_context>
chip_gen: v5e
topology: v5e:2x2
jax: 0.10.0
libtpu: 0.0.40
codegen_flags: <defaults>
</compile_context>

<pallas_src>
import jax
import jax.numpy as jnp
from jax.experimental import pallas as pl
from jax.experimental.pallas import tpu as pltpu

LANE = 128  # TPU lane width; all feature dims padded to multiples of this.


def _round_up(x, m):
    return ((x + m - 1) // m) * m


def _make_fused_snn_kernel(num_layers):
    """Fused forward kernel: chain all layers; activations never leave the chip."""

    def kernel(x_ref, w_ref, o_ref):
        alpha = 10.0
        h = x_ref[...].astype(jnp.float32)
        for li in range(num_layers):  # static unrolled layer loop
            w = w_ref[li]  # (P, P) bf16, static index into the resident stack
            # bf16 x bf16 -> f32 accumulation on the MXU.
            pre = jnp.dot(
                h.astype(jnp.bfloat16), w, preferred_element_type=jnp.float32
            )
            z = alpha * (pre - 1.0)
            # Numerically stable sigmoid, all f32 elementwise (v5e-safe):
            #   z >= 0: 1 / (1 + e^-z),   z < 0: e^z / (1 + e^z)
            e = jnp.exp(-jnp.abs(z))
            h = jnp.where(z >= 0.0, 1.0 / (1.0 + e), e / (1.0 + e))
        o_ref[...] = h.astype(o_ref.dtype)

    return kernel


def prepare_spiking_network_weights(params):
    """One-time prep: pad every W_i to a uniform (P, P) lane-dense tile, cast to
    bf16, and stack into a single [L, P, P] array.  P = max padded feature dim.

    Returns (w_stack_bf16, sizes) where sizes = [in_0, out_0, out_1, ...]."""
    sizes = [params[0].shape[0]] + [w.shape[1] for w in params]
    P = max(_round_up(s, LANE) for s in sizes)
    stacked = []
    for w in params:
        k, n = w.shape
        wp = jnp.pad(w, ((0, P - k), (0, P - n))).astype(jnp.bfloat16)
        stacked.append(wp)
    return jnp.stack(stacked, axis=0), sizes


def spiking_neural_network_forward(x, w_stack, sizes):
    """Forward pass of SpikingNeuralNetwork as a single fused Pallas kernel.

    x:       (batch, in_features) f32
    w_stack: (L, P, P) bf16 from prepare_spiking_network_weights
    sizes:   [in_0, out_0, ..., out_{L-1}] true feature widths
    returns  (batch, out_last) f32
    """
    B, K0 = x.shape
    num_layers, P, _ = w_stack.shape
    assert sizes[0] == K0 and len(sizes) == num_layers + 1

    # Batch tiling.
    Bp8 = _round_up(B, 8)
    if Bp8 <= 128:
        tm = Bp8            # tiny batch: single grid step, latency-bound
    elif Bp8 <= 512:
        tm = 128            # >=2 parallel grid steps -> both v7x TensorCores used
    else:
        tm = 256            # fills the 256-deep MXU on v6e/v7x, still >=2 steps
    Bp = _round_up(B, tm)
    grid = (Bp // tm,)

    # Only x is padded per call (weights were padded/cast once at prep time).
    x_p = jnp.pad(x, ((0, Bp - B), (0, P - K0)))

    in_specs = [
        pl.BlockSpec((tm, P), lambda i: (i, 0)),                  # x tile
        pl.BlockSpec((num_layers, P, P), lambda i: (0, 0, 0)),    # full weight stack
    ]
    out_spec = pl.BlockSpec((tm, P), lambda i: (i, 0))

    # Advisory cost estimate (real FLOP/byte counts) so XLA schedules the
    # surrounding pad/slice ops sensibly around this tiny custom call.
    flops = 2 * B * sum(sizes[i] * sizes[i + 1] for i in range(num_layers))
    transcendentals = B * sum(sizes[1:])
    bytes_accessed = (
        x_p.size * x_p.dtype.itemsize
        + w_stack.size * w_stack.dtype.itemsize
        + Bp * P * jnp.dtype(x.dtype).itemsize
    )

    out_p = pl.pallas_call(
        _make_fused_snn_kernel(num_layers),
        out_shape=jax.ShapeDtypeStruct((Bp, P), x.dtype),
        grid_spec=pltpu.PrefetchScalarGridSpec(
            num_scalar_prefetch=0,
            grid=grid,
            in_specs=in_specs,
            out_specs=out_spec,
        ),
        compiler_params=pltpu.CompilerParams(
            dimension_semantics=("parallel",),  # batch tiles shard across TCs
        ),
        cost_estimate=pl.CostEstimate(
            flops=flops,
            transcendentals=transcendentals,
            bytes_accessed=bytes_accessed,
        ),
    )(x_p, w_stack)

    return out_p[:B, : sizes[-1]]


def init_spiking_network_params(layer_sizes, key):
    """Deterministic parameter init: W_i ~ N(0, 1) * 0.01, shape (in, out)."""
    params = []
    for i in range(len(layer_sizes) - 1):
        key, sub = jax.random.split(key)
        w = jax.random.normal(
            sub, (layer_sizes[i], layer_sizes[i + 1]), dtype=jnp.float32
        ) * 0.01
        params.append(w)
    return params


if __name__ == "__main__":
    key = jax.random.PRNGKey(0)

    # Small MNIST-like layer sizes and a small batch.
    MNIST_LAYER_SIZES = [64, 128, 32, 16]
    batch = 8

    key, kx, kp = jax.random.split(key, 3)
    x = jax.random.normal(kx, (batch, MNIST_LAYER_SIZES[0]), dtype=jnp.float32)
    params = init_spiking_network_params(MNIST_LAYER_SIZES, kp)

    # One-time weight prep (pad + bf16 cast + stack), then the fused forward.
    w_stack, sizes = prepare_spiking_network_weights(params)
    out = spiking_neural_network_forward(x, w_stack, sizes)
    out = jax.block_until_ready(out)

    # Pure-JAX f32 reference (original module semantics).
    ref = x
    for w in params:
        ref = jax.nn.sigmoid(10.0 * (ref @ w - 1.0))

    assert out.shape == (batch, MNIST_LAYER_SIZES[-1])
    # Tolerance covers the bf16 MXU operands; with z ~= -10 in the deep layers
    # the sigmoid damps relative error heavily, so this is comfortable.
    assert jnp.allclose(out, ref, atol=1e-6, rtol=2e-3), (
        float(jnp.max(jnp.abs(out - ref)))
    )

    print("KERNEL_OK")
</pallas_src>

<mosaic_0001>
module attributes {stable_mosaic.version = 11 : i64} {
  func.func @kernel(%arg0: i32, %arg1: memref<8x128xf32, #tpu.memory_space<vmem>>, %arg2: memref<3x128x128xbf16, #tpu.memory_space<vmem>>, %arg3: memref<8x128xf32, #tpu.memory_space<vmem>>) attributes {dimension_semantics = [#tpu.dimension_semantics<parallel>], iteration_bounds = array<i64: 1>, scalar_prefetch = 0 : i64, scratch_operands = 0 : i64, tpu.core_type = #tpu.core_type<tc>, window_params = [{transform_indices = @transform_0, window_bounds = array<i64: 8, 128>}, {pipeline_mode = #tpu.pipeline_mode<synchronous>, transform_indices = @transform_1, window_bounds = array<i64: 3, 128, 128>}, {transform_indices = @transform_2, window_bounds = array<i64: 8, 128>}]} {
    %c0 = arith.constant 0 : index
    %c0_0 = arith.constant 0 : index
    %0 = vector.load %arg1[%c0, %c0_0] : memref<8x128xf32, #tpu.memory_space<vmem>>, vector<8x128xf32>
    %c0_1 = arith.constant 0 : index
    %c0_2 = arith.constant 0 : index
    %c0_3 = arith.constant 0 : index
    %1 = vector.load %arg2[%c0_1, %c0_2, %c0_3] : memref<3x128x128xbf16, #tpu.memory_space<vmem>>, vector<1x128x128xbf16>
    %2 = vector.shape_cast %1 : vector<1x128x128xbf16> to vector<128x128xbf16>
    %3 = arith.truncf %0 : vector<8x128xf32> to vector<8x128xbf16>
    %cst = arith.constant dense<0.000000e+00> : vector<8x128xf32>
    %4 = tpu.matmul %3, %2, %cst {dimension_numbers = #tpu.dot_dimension_numbers<[1], [0], [0], [1], [0, 0, 1, 1], [], []>} : vector<8x128xbf16>, vector<128x128xbf16>, vector<8x128xf32> -> vector<8x128xf32>
    %cst_4 = arith.constant 1.000000e+00 : f32
    %5 = vector.broadcast %cst_4 : f32 to vector<8x128xf32>
    %6 = arith.subf %4, %5 : vector<8x128xf32>
    %cst_5 = arith.constant 1.000000e+01 : f32
    %7 = vector.broadcast %cst_5 : f32 to vector<8x128xf32>
    %8 = arith.mulf %7, %6 : vector<8x128xf32>
    %9 = math.absf %8 : vector<8x128xf32>
    %cst_6 = arith.constant 0.000000e+00 : f32
    %10 = vector.broadcast %cst_6 : f32 to vector<8x128xf32>
    %11 = arith.subf %10, %9 : vector<8x128xf32>
    %12 = math.exp %11 : vector<8x128xf32>
    %cst_7 = arith.constant 0.000000e+00 : f32
    %13 = vector.broadcast %cst_7 : f32 to vector<8x128xf32>
    %14 = arith.cmpf oge, %8, %13 : vector<8x128xf32>
    %cst_8 = arith.constant 1.000000e+00 : f32
    %15 = vector.broadcast %cst_8 : f32 to vector<8x128xf32>
    %16 = arith.addf %15, %12 : vector<8x128xf32>
    %cst_9 = arith.constant 1.000000e+00 : f32
    %17 = vector.broadcast %cst_9 : f32 to vector<8x128xf32>
    %18 = arith.divf %17, %16 : vector<8x128xf32>
    %cst_10 = arith.constant 1.000000e+00 : f32
    %19 = vector.broadcast %cst_10 : f32 to vector<8x128xf32>
    %20 = arith.addf %19, %12 : vector<8x128xf32>
    %21 = arith.divf %12, %20 : vector<8x128xf32>
    %22 = arith.select %14, %18, %21 : vector<8x128xi1>, vector<8x128xf32>
    %c1 = arith.constant 1 : index
    %c0_11 = arith.constant 0 : index
    %c0_12 = arith.constant 0 : index
    %23 = vector.load %arg2[%c1, %c0_11, %c0_12] : memref<3x128x128xbf16, #tpu.memory_space<vmem>>, vector<1x128x128xbf16>
    %24 = vector.shape_cast %23 : vector<1x128x128xbf16> to vector<128x128xbf16>
    %25 = arith.truncf %22 : vector<8x128xf32> to vector<8x128xbf16>
    %cst_13 = arith.constant dense<0.000000e+00> : vector<8x128xf32>
    %26 = tpu.matmul %25, %24, %cst_13 {dimension_numbers = #tpu.dot_dimension_numbers<[1], [0], [0], [1], [0, 0, 1, 1], [], []>} : vector<8x128xbf16>, vector<128x128xbf16>, vector<8x128xf32> -> vector<8x128xf32>
    %cst_14 = arith.constant 1.000000e+00 : f32
    %27 = vector.broadcast %cst_14 : f32 to vector<8x128xf32>
    %28 = arith.subf %26, %27 : vector<8x128xf32>
    %cst_15 = arith.constant 1.000000e+01 : f32
    %29 = vector.broadcast %cst_15 : f32 to vector<8x128xf32>
    %30 = arith.mulf %29, %28 : vector<8x128xf32>
    %31 = math.absf %30 : vector<8x128xf32>
    %cst_16 = arith.constant 0.000000e+00 : f32
    %32 = vector.broadcast %cst_16 : f32 to vector<8x128xf32>
    %33 = arith.subf %32, %31 : vector<8x128xf32>
    %34 = math.exp %33 : vector<8x128xf32>
    %cst_17 = arith.constant 0.000000e+00 : f32
    %35 = vector.broadcast %cst_17 : f32 to vector<8x128xf32>
    %36 = arith.cmpf oge, %30, %35 : vector<8x128xf32>
    %cst_18 = arith.constant 1.000000e+00 : f32
    %37 = vector.broadcast %cst_18 : f32 to vector<8x128xf32>
    %38 = arith.addf %37, %34 : vector<8x128xf32>
    %cst_19 = arith.constant 1.000000e+00 : f32
    %39 = vector.broadcast %cst_19 : f32 to vector<8x128xf32>
    %40 = arith.divf %39, %38 : vector<8x128xf32>
    %cst_20 = arith.constant 1.000000e+00 : f32
    %41 = vector.broadcast %cst_20 : f32 to vector<8x128xf32>
    %42 = arith.addf %41, %34 : vector<8x128xf32>
    %43 = arith.divf %34, %42 : vector<8x128xf32>
    %44 = arith.select %36, %40, %43 : vector<8x128xi1>, vector<8x128xf32>
    %c2 = arith.constant 2 : index
    %c0_21 = arith.constant 0 : index
    %c0_22 = arith.constant 0 : index
    %45 = vector.load %arg2[%c2, %c0_21, %c0_22] : memref<3x128x128xbf16, #tpu.memory_space<vmem>>, vector<1x128x128xbf16>
    %46 = vector.shape_cast %45 : vector<1x128x128xbf16> to vector<128x128xbf16>
    %47 = arith.truncf %44 : vector<8x128xf32> to vector<8x128xbf16>
    %cst_23 = arith.constant dense<0.000000e+00> : vector<8x128xf32>
    %48 = tpu.matmul %47, %46, %cst_23 {dimension_numbers = #tpu.dot_dimension_numbers<[1], [0], [0], [1], [0, 0, 1, 1], [], []>} : vector<8x128xbf16>, vector<128x128xbf16>, vector<8x128xf32> -> vector<8x128xf32>
    %cst_24 = arith.constant 1.000000e+00 : f32
    %49 = vector.broadcast %cst_24 : f32 to vector<8x128xf32>
    %50 = arith.subf %48, %49 : vector<8x128xf32>
    %cst_25 = arith.constant 1.000000e+01 : f32
    %51 = vector.broadcast %cst_25 : f32 to vector<8x128xf32>
    %52 = arith.mulf %51, %50 : vector<8x128xf32>
    %53 = math.absf %52 : vector<8x128xf32>
    %cst_26 = arith.constant 0.000000e+00 : f32
    %54 = vector.broadcast %cst_26 : f32 to vector<8x128xf32>
    %55 = arith.subf %54, %53 : vector<8x128xf32>
    %56 = math.exp %55 : vector<8x128xf32>
    %cst_27 = arith.constant 0.000000e+00 : f32
    %57 = vector.broadcast %cst_27 : f32 to vector<8x128xf32>
    %58 = arith.cmpf oge, %52, %57 : vector<8x128xf32>
    %cst_28 = arith.constant 1.000000e+00 : f32
    %59 = vector.broadcast %cst_28 : f32 to vector<8x128xf32>
    %60 = arith.addf %59, %56 : vector<8x128xf32>
    %cst_29 = arith.constant 1.000000e+00 : f32
    %61 = vector.broadcast %cst_29 : f32 to vector<8x128xf32>
    %62 = arith.divf %61, %60 : vector<8x128xf32>
    %cst_30 = arith.constant 1.000000e+00 : f32
    %63 = vector.broadcast %cst_30 : f32 to vector<8x128xf32>
    %64 = arith.addf %63, %56 : vector<8x128xf32>
    %65 = arith.divf %56, %64 : vector<8x128xf32>
    %66 = arith.select %58, %62, %65 : vector<8x128xi1>, vector<8x128xf32>
    %c0_31 = arith.constant 0 : index
    %c0_32 = arith.constant 0 : index
    %67 = vector.load %arg3[%c0_31, %c0_32] : memref<8x128xf32, #tpu.memory_space<vmem>>, vector<8x128xf32>
    tpu.vector_store %arg3[%c0_31, %c0_32], %66 {strides = array<i32>} : memref<8x128xf32, #tpu.memory_space<vmem>>, vector<8x128xf32>,
    return
  }
  func.func @transform_0(%arg0: i32) -> (i32, i32) {
    %c0_i32 = arith.constant 0 : i32
    %c0_i32_0 = arith.constant 0 : i32
    return %arg0, %c0_i32 : i32, i32
  }
  func.func @transform_1(%arg0: i32) -> (i32, i32, i32) {
    %c0_i32 = arith.constant 0 : i32
    %c0_i32_0 = arith.constant 0 : i32
    %c0_i32_1 = arith.constant 0 : i32
    %c0_i32_2 = arith.constant 0 : i32
    return %c0_i32, %c0_i32_0, %c0_i32_1 : i32, i32, i32
  }
  func.func @transform_2(%arg0: i32) -> (i32, i32) {
    %c0_i32 = arith.constant 0 : i32
    %c0_i32_0 = arith.constant 0 : i32
    return %arg0, %c0_i32 : i32, i32
  }
}

</mosaic_0001>

<bundles_post_ra>
// kernel: tpu_custom_call.1
= control target key start
LH: loop header
LB: loop body
LE: loop exit
PB: predicated region body
PF: predicated region fallthrough
CT: control target
= control target key end

     0   :  { %7 = vsyncpa [#allocation3], 0  ;;  %s620_s0 = inlined_call_operand.hbm [shape: f32[8,128], index: 0, kind: input, shape index: {}]   ;;  %s621_s1 = inlined_call_operand.hbm [shape: bf16[3,128,128], index: 1, kind: input, shape index: {}]   ;;  %s622_s2 = inlined_call_operand.hbm [shape: f32[8,128], index: 2, kind: output, shape index: {}]  }
   0x1   :  { %8 = vsyncpa [#allocation6], 0 }
   0x2   :  { %9 = vsyncpa [#allocation4], 0  ;;  %s15_s11 = sshll.u32 %s620_s0, 4  ;;  %s591_s12 = smov [#allocation2]   ;;  %s16_s11 = int_to_ptr.hbm [resolvable:$true] %s15_s11 }
   0x3   :  { %s17_s13 = sshll.u32 %s591_s12, 4  ;;  %s25_s16 = sshll.u32 %s621_s1, 4  ;;  %s18_s13 = int_to_ptr.vmem [resolvable:$true] %s17_s13  ;;  %s26_s16 = int_to_ptr.hbm [resolvable:$true] %s25_s16 }
   0x4   :  { %20 = dma.hbm_to_vmem [thread:$0]  %s16_s11, 128, %s18_s13, [#allocation3]  }
   0x5   :  { %s592_s17 = smov [#allocation5]   ;;  %s593_s19 = smov 64  }
   0x6   :  { %s27_s18 = sshll.u32 %s592_s17, 4  ;;  %s594_s20 = smov 4   ;;  %s28_s18 = int_to_ptr.vmem [resolvable:$true] %s27_s18 }
   0x7   :  { %33 = dma.hbm_to_vmem [thread:$0]  %s26_s16, 3072, %s28_s18, [#allocation6], %s593_s19, %s593_s19, %s594_s20  }
   0x8   :  { %585 = dma.done.wait [#allocation3], 128  }
   0x9   :  { %586 = vsyncadd [#allocation3], 4294967168 }
   0xa   :  { %587 = dma.done.wait [#allocation6], 3072  }
   0xb   :  { %588 = vsyncadd [#allocation6], 4294964224  ;;  %v479_v0 = vld [vmem:[#allocation5 + $0x38] sm:$0xff]  ;;  %v478_v1 = vld [vmem:[#allocation5 + $0x30] sm:$0xff]  ;;  %s595_s0 = smov [#allocation7]   ;;  %s362_s23 = sshll.u32 %s622_s2, 4  ;;  %s363_s23 = int_to_ptr.hbm [resolvable:$true] %s362_s23 }
   0xc   :  { %108 = vmatpush.bf16.msra.mxu0 %v479_v0  ;;  %v477_v2 = vld [vmem:[#allocation5 + $0x28] sm:$0xff]  ;;  %v476_v3 = vld [vmem:[#allocation5 + $0x20] sm:$0xff]  ;;  %v475_v4 = vld [vmem:[#allocation5 + $0x18] sm:$0xff]  ;;  %s360_s1 = sshll.u32 %s595_s0, 4  ;;  %s361_s1 = int_to_ptr.vmem [resolvable:$true] %s360_s1 }
   0xd   :  { %v474_v5 = vld [vmem:[#allocation5 + $0x10] sm:$0xff]  ;;  %v473_v6 = vld [vmem:[#allocation5 + $0x8] sm:$0xff]  ;;  %v472_v7 = vld [vmem:[#allocation5] sm:$0xff] }
   0xe   :  { %v42_v8 = vld [vmem:[#allocation2] sm:$0xff]  ;;  %v486_v11 = vld [vmem:[#allocation5 + $0x70] sm:$0xff]  ;;  %v485_v12 = vld [vmem:[#allocation5 + $0x68] sm:$0xff] }
   0xf   :  { %v59_v9 = vpack.c.bf16 %v42_v8, %v42_v8  ;;  %v487_v10 = vld [vmem:[#allocation5 + $0x78] sm:$0xff]  ;;  %v484_v13 = vld [vmem:[#allocation5 + $0x60] sm:$0xff]  ;;  %v482_v15 = vld [vmem:[#allocation5 + $0x50] sm:$0xff] }
  0x10   :  { %109 = vmatpush.bf16.msra.mxu0 %v478_v1  ;;  %212 = vmatpush.bf16.msra.mxu1 %v487_v10  ;;  %v483_v14 = vld [vmem:[#allocation5 + $0x58] sm:$0xff]  ;;  %v481_v16 = vld [vmem:[#allocation5 + $0x48] sm:$0xff]  ;;  %v480_v20 = vld [vmem:[#allocation5 + $0x40] sm:$0xff] }
  0x11   :  { %v495_v40 = vld [vmem:[#allocation5 + $0xb8] sm:$0xff]  ;;  %v494_v41 = vld [vmem:[#allocation5 + $0xb0] sm:$0xff]  ;;  %v493_v42 = vld [vmem:[#allocation5 + $0xa8] sm:$0xff] }
  0x12   :  { %316 = vmatpush.bf16.msra.mxu2 %v495_v40  ;;  %v492_v43 = vld [vmem:[#allocation5 + $0xa0] sm:$0xff]  ;;  %v491_v44 = vld [vmem:[#allocation5 + $0x98] sm:$0xff]  ;;  %v490_v45 = vld [vmem:[#allocation5 + $0x90] sm:$0xff] }
  0x13   :  { %v489_v46 = vld [vmem:[#allocation5 + $0x88] sm:$0xff]  ;;  %v488_v50 = vld [vmem:[#allocation5 + $0x80] sm:$0xff] }
  0x14   :  { %110 = vmatpush.bf16.msra.mxu0 %v477_v2  ;;  %213 = vmatpush.bf16.msra.mxu1 %v486_v11 }
  0x16   :  { %317 = vmatpush.bf16.msra.mxu2 %v494_v41 }
  0x18   :  { %111 = vmatpush.bf16.msra.mxu0 %v476_v3  ;;  %214 = vmatpush.bf16.msra.mxu1 %v485_v12 }
  0x1a   :  { %318 = vmatpush.bf16.msra.mxu2 %v493_v42 }
  0x1c   :  { %112 = vmatpush.bf16.msra.mxu0 %v475_v4  ;;  %215 = vmatpush.bf16.msra.mxu1 %v484_v13 }
  0x1e   :  { %319 = vmatpush.bf16.msra.mxu2 %v492_v43 }
  0x20   :  { %113 = vmatpush.bf16.msra.mxu0 %v474_v5  ;;  %216 = vmatpush.bf16.msra.mxu1 %v483_v14 }
  0x22   :  { %320 = vmatpush.bf16.msra.mxu2 %v491_v44 }
  0x24   :  { %114 = vmatpush.bf16.msra.mxu0 %v473_v6  ;;  %217 = vmatpush.bf16.msra.mxu1 %v482_v15 }
  0x26   :  { %321 = vmatpush.bf16.msra.mxu2 %v490_v45 }
  0x28   :  { %115 = vmatpush.bf16.msra.mxu0 %v472_v7  ;;  %218 = vmatpush.bf16.msra.mxu1 %v481_v16 }
  0x2a   :  { %322 = vmatpush.bf16.msra.mxu2 %v489_v46 }
  0x2b   :  { %116 = vmatmul.bf16.vlgmr.msra.gmra.mxu0 %v59_v9 }
  0x2c   :  { %219 = vmatpush.bf16.msra.mxu1 %v480_v20 }
  0x2e   :  { %323 = vmatpush.bf16.msra.mxu2 %v488_v50 }
  0xa8   :  { %v117_v17 = vpop.f32.mrf.mxu0 }
  0xa9   :  { %v405_v18 = vadd.f32 -1.0, %v117_v17 }
  0xab   :  { %v122_v19 = vmul.f32 10.0, %v405_v18 }
  0xad   :  { %v123_v21 = vand.u32 2147483647, %v122_v19  ;;  %vm127_vm4 = vcmp.ge.f32.partialorder %v122_v19, 0.0 }
  0xaf   :  { %v124_v22 = vsub.f32 0.0, %v123_v21 }
  0xb0   :  { %v119_v23 = vpop.f32.mrf.mxu0 }
  0xb1   :  { %v125_v24 = vmul.f32 1.442695, %v124_v22 }
  0xb3   :  { %501 = vpow2.f32 %v125_v24 }
  0xb9   :  { %v502_v25 = vpop.eup %501 }
  0xba   :  { %v128_v26 = vadd.f32 1.0, %v502_v25 }
  0xbc   :  { %503 = vrcp.f32 %v128_v26  ;;  %v140_v30 = vand.u32 2147483648, %v128_v26  ;;  %v138_v32 = vand.u32 2147483647, %v128_v26  ;;  %vm134_vm1 = vweird.f32 %v128_v26 }
  0xbe   :  { %v141_v34 = vor.u32 1.1754944e-38, %v140_v30  ;;  %vm139_vm3 = vcmp.eq.f32.partialorder %v138_v32, 8.507059e+37 }
  0xc2   :  { %v504_v27 = vpop.eup %503 }
  0xc3   :  { %v130_v28 = vmul.f32 %v504_v27, %v128_v26  ;;  %vm135_vm0 = vweird.f32 %v504_v27 }
  0xc4   :  { %vm136_vm2 = vmor %vm134_vm1, %vm135_vm0 }
  0xc5   :  { %v131_v29 = vsub.f32 1.0, %v130_v28 }
  0xc7   :  { %v132_v31 = vmul.f32 %v504_v27, %v131_v29 }
  0xc9   :  { %v133_v33 = vadd.f32 %v504_v27, %v132_v31 }
  0xcb   :  { %v137_v35 = vsel %vm136_vm2, %v504_v27, %v133_v33 }
  0xcc   :  { %v142_v36 = vsel %vm139_vm3, %v141_v34, %v137_v35 }
  0xcd   :  { %v144_v37 = vmul.f32 %v502_v25, %v142_v36 }
  0xcf   :  { %v145_v38 = vsel %vm127_vm4, %v142_v36, %v144_v37 }
  0xd0   :  { %v163_v39 = vpack.c.bf16 %v145_v38, %v145_v38 }
  0xd2   :  { %220 = vmatmul.bf16.vlgmr.msra.gmra.mxu1 %v163_v39 }
 0x14f   :  { %v221_v47 = vpop.f32.mrf.mxu1 }
 0x150   :  { %v438_v48 = vadd.f32 -1.0, %v221_v47 }
 0x152   :  { %v226_v49 = vmul.f32 10.0, %v438_v48 }
 0x154   :  { %v227_v51 = vand.u32 2147483647, %v226_v49  ;;  %vm231_vm9 = vcmp.ge.f32.partialorder %v226_v49, 0.0 }
 0x156   :  { %v228_v52 = vsub.f32 0.0, %v227_v51 }
 0x157   :  { %v223_v53 = vpop.f32.mrf.mxu1 }
 0x158   :  { %v229_v54 = vmul.f32 1.442695, %v228_v52 }
 0x15a   :  { %505 = vpow2.f32 %v229_v54 }
 0x160   :  { %v506_v55 = vpop.eup %505 }
 0x161   :  { %v232_v56 = vadd.f32 1.0, %v506_v55 }
 0x163   :  { %507 = vrcp.f32 %v232_v56  ;;  %v244_v60 = vand.u32 2147483648, %v232_v56  ;;  %v242_v62 = vand.u32 2147483647, %v232_v56  ;;  %vm238_vm6 = vweird.f32 %v232_v56 }
 0x165   :  { %v245_v0 = vor.u32 1.1754944e-38, %v244_v60  ;;  %vm243_vm8 = vcmp.eq.f32.partialorder %v242_v62, 8.507059e+37 }
 0x169   :  { %v508_v57 = vpop.eup %507 }
 0x16a   :  { %v234_v58 = vmul.f32 %v508_v57, %v232_v56  ;;  %vm239_vm5 = vweird.f32 %v508_v57 }
 0x16b   :  { %vm240_vm7 = vmor %vm238_vm6, %vm239_vm5 }
 0x16c   :  { %v235_v59 = vsub.f32 1.0, %v234_v58 }
 0x16e   :  { %v236_v61 = vmul.f32 %v508_v57, %v235_v59 }
 0x170   :  { %v237_v63 = vadd.f32 %v508_v57, %v236_v61 }
 0x172   :  { %v241_v1 = vsel %vm240_vm7, %v508_v57, %v237_v63 }
 0x173   :  { %v246_v2 = vsel %vm243_vm8, %v245_v0, %v241_v1 }
 0x174   :  { %v248_v3 = vmul.f32 %v506_v55, %v246_v2 }
 0x176   :  { %v249_v4 = vsel %vm231_vm9, %v246_v2, %v248_v3 }
 0x177   :  { %v267_v5 = vpack.c.bf16 %v249_v4, %v249_v4 }
 0x179   :  { %324 = vmatmul.bf16.vlgmr.msra.gmra.mxu2 %v267_v5 }
 0x1fc   :  { %v325_v6 = vpop.f32.mrf.mxu2 }
 0x1fd   :  { %v471_v7 = vadd.f32 -1.0, %v325_v6 }
 0x1ff   :  { %v330_v8 = vmul.f32 10.0, %v471_v7 }
 0x201   :  { %v331_v9 = vand.u32 2147483647, %v330_v8  ;;  %vm335_vm14 = vcmp.ge.f32.partialorder %v330_v8, 0.0 }
 0x203   :  { %v332_v10 = vsub.f32 0.0, %v331_v9 }
 0x204   :  { %v327_v11 = vpop.f32.mrf.mxu2 }
 0x205   :  { %v333_v12 = vmul.f32 1.442695, %v332_v10 }
 0x207   :  { %509 = vpow2.f32 %v333_v12 }
 0x20d   :  { %v510_v13 = vpop.eup %509 }
 0x20e   :  { %v336_v14 = vadd.f32 1.0, %v510_v13 }
 0x210   :  { %511 = vrcp.f32 %v336_v14  ;;  %v348_v18 = vand.u32 2147483648, %v336_v14  ;;  %v346_v20 = vand.u32 2147483647, %v336_v14  ;;  %vm342_vm11 = vweird.f32 %v336_v14 }
 0x212   :  { %v349_v22 = vor.u32 1.1754944e-38, %v348_v18  ;;  %vm347_vm13 = vcmp.eq.f32.partialorder %v346_v20, 8.507059e+37 }
 0x216   :  { %v512_v15 = vpop.eup %511 }
 0x217   :  { %v338_v16 = vmul.f32 %v512_v15, %v336_v14  ;;  %vm343_vm10 = vweird.f32 %v512_v15 }
 0x218   :  { %vm344_vm12 = vmor %vm342_vm11, %vm343_vm10 }
 0x219   :  { %v339_v17 = vsub.f32 1.0, %v338_v16 }
 0x21b   :  { %v340_v19 = vmul.f32 %v512_v15, %v339_v17 }
 0x21d   :  { %v341_v21 = vadd.f32 %v512_v15, %v340_v19 }
 0x21f   :  { %v345_v23 = vsel %vm344_vm12, %v512_v15, %v341_v21 }
 0x220   :  { %v350_v24 = vsel %vm347_vm13, %v349_v22, %v345_v23 }
 0x221   :  { %v352_v25 = vmul.f32 %v510_v13, %v350_v24 }
 0x223   :  { %v353_v26 = vsel %vm335_vm14, %v350_v24, %v352_v25 }
 0x224   :  { %354 = vst [vmem:[#allocation7] sm:$0xff] %v353_v26 }
 0x225   :  { %365 = dma.vmem_to_hbm [thread:$0]  %s361_s1, 128, %s363_s23, [#allocation4]  }
 0x226   :  { %589 = dma.done.wait [#allocation4], 128  }
 0x227   :  { %590 = vsyncadd [#allocation4], 4294967168 }
 0x228   :  { %370 = vsyncpa [#allocation3], 1 }
 0x229   :  { %371 = vsyncpa [#allocation6], 1 }
 0x22a   :  { %372 = vsyncpa [#allocation4], 1 }

</bundles_post_ra>
